<compile_context>
chip_gen: v5e
topology: v5e:2x2
jax: 0.10.0
libtpu: 0.0.40
codegen_flags: <defaults>
</compile_context>

<pallas_src>
import jax
import jax.numpy as jnp
from jax.experimental import pallas as pl
from jax.experimental.pallas import tpu as pltpu

# ---------------- config consistent with the module ----------------
B = 2
N_VARS = 4            # configs.enc_in
SEQ_LEN = 32          # configs.seq_len
PRED_LEN = 8          # configs.pred_len
PATCH_LEN = 16        # configs.patch_len
STRIDE = 8            # configs.stride
D_MODEL = 16          # configs.d_model
D_FF = 16             # configs.d_ff
D_LLM = 32            # configs.llm_dim
PATCH_NUMS = (SEQ_LEN - PATCH_LEN) // STRIDE + 2   # == 4
HEAD_NF = D_FF * PATCH_NUMS                        # == 64
EPS = 1e-5
ROW_BLOCK = 8         # (B*N)-series per grid step; multiple of 8 sublanes


# ================================ kernel ================================

def _forecast_kernel(x_ref, w_ref, b_ref, o_ref):
    """Fully fused forecast for one block of ROW_BLOCK series (rows = (b, n) pairs):
       Normalize('norm') -> ReplicationPad1d((0, stride)) + unfold (PatchEmbedding)
       -> folded linear chain (Conv1d / reprogramming / LLM stand-in / FlattenHead)
       -> Normalize('denorm')."""
    x = x_ref[...]                                         # (R, T) float32
    # --- Normalize(affine=False), 'norm' branch ----------------------------
    mean = jnp.mean(x, axis=1, keepdims=True)              # (R, 1)
    xc = x - mean
    var = jnp.mean(xc * xc, axis=1, keepdims=True)         # biased variance
    std = jnp.sqrt(var + EPS)
    xn = xc / std                                          # normalized series
    # --- PatchEmbedding data movement: replication-pad then unfold ---------
    pad = jnp.broadcast_to(xn[:, SEQ_LEN - 1:SEQ_LEN], (xn.shape[0], STRIDE))
    xp = jnp.concatenate([xn, pad], axis=1)                # (R, T + stride)
    patches = jnp.concatenate(
        [xp[:, p * STRIDE: p * STRIDE + PATCH_LEN] for p in range(PATCH_NUMS)],
        axis=1)                                            # (R, patch_nums*patch_len)
    # --- folded conv -> reprog -> LLM stand-in -> head: one MXU matmul -----
    y = jnp.dot(patches, w_ref[...], preferred_element_type=jnp.float32)
    y = y + b_ref[...]                                     # (R, pred_len)
    # --- Normalize 'denorm' -------------------------------------------------
    o_ref[...] = y * std + mean


# ================================ model ================================

def init_params(key):
    ks = jax.random.split(key, 6)
    p = {}
    # TokenEmbedding: Conv1d(patch_len -> d_model, kernel=3, circular, bias=False)
    p["conv_w"] = jax.random.normal(ks[0], (D_MODEL, PATCH_LEN, 3), jnp.float32) * 0.05
    # ReprogrammingLayer.shortcut: Linear(d_model -> d_llm)
    p["reprog_w"] = jax.random.normal(ks[1], (D_MODEL, D_LLM), jnp.float32) * 0.05
    p["reprog_b"] = jax.random.normal(ks[2], (D_LLM,), jnp.float32) * 0.01
    # TODO(synk): prompt string formatting + tokenizer + frozen-LLM backbone have no
    # Pallas equivalent; a token-wise Linear(d_llm -> d_llm) stand-in is used, under
    # which prompt tokens are sliced away by dec_out[..., -patch_nums:] and dropped.
    p["llm_w"] = jax.random.normal(ks[3], (D_LLM, D_LLM), jnp.float32) * 0.05
    p["llm_b"] = jnp.zeros((D_LLM,), jnp.float32)
    # FlattenHead: Linear(head_nf -> pred_len)
    p["head_w"] = jax.random.normal(ks[4], (HEAD_NF, PRED_LEN), jnp.float32) * 0.05
    p["head_b"] = jax.random.normal(ks[5], (PRED_LEN,), jnp.float32) * 0.01
    return p


def fold_params(p):
    """One-off host/XLA fold of the purely linear chain
         circular Conv1d(k=3, im2col)  ->  reprogramming Linear  ->  LLM stand-in Linear
         ->  [:, :d_ff] slice          ->  FlattenHead Linear
       into one (patch_nums*patch_len, pred_len) weight + (pred_len,) bias that is
       applied directly to the unfolded, replication-padded normalized series."""
    # Conv1d as im2col: tap k of conv_w multiplies patch (pos - 1 + k) mod patch_nums.
    w_conv = jnp.transpose(p["conv_w"], (2, 1, 0)).reshape(3 * PATCH_LEN, D_MODEL)   # (48,16)
    w_chain = w_conv @ p["reprog_w"] @ p["llm_w"][:, :D_FF]                          # (48,16)
    b_chain = p["reprog_b"] @ p["llm_w"][:, :D_FF] + p["llm_b"][:D_FF]               # (16,)
    # FlattenHead flattens (d_ff, patch_nums): flat[f*P + pos] = feat[pos, f]
    head_w = p["head_w"].reshape(D_FF, PATCH_NUMS, PRED_LEN)                         # H_pos = [:, pos, :]
    w_patch = jnp.zeros((PATCH_NUMS, PATCH_LEN, PRED_LEN), jnp.float32)
    for pos in range(PATCH_NUMS):
        w_pos = w_chain @ head_w[:, pos, :]                                          # (48, 8)
        for tap in range(3):                      # circular conv taps t-1, t, t+1
            q = (pos - 1 + tap) % PATCH_NUMS
            w_patch = w_patch.at[q].add(w_pos[tap * PATCH_LEN:(tap + 1) * PATCH_LEN])
    b_fused = b_chain @ head_w.sum(axis=1) + p["head_b"]                             # (8,)
    return {"w_fused": w_patch.reshape(HEAD_NF, PRED_LEN),
            "b_fused": b_fused.reshape(1, PRED_LEN)}


def forecast(fused, x_enc):
    Bb, T, Nv = x_enc.shape
    BN = Bb * Nv
    # (B, T, N) -> lane-dense (B*N, T); row index = b*N + n, matching the reference's
    # x_enc.permute(0, 2, 1).reshape(B*N, T).
    xr = jnp.transpose(x_enc, (0, 2, 1)).reshape(BN, T)
    if BN % ROW_BLOCK == 0:
        rb, grid = ROW_BLOCK, (BN // ROW_BLOCK,)
    else:
        rb, grid = BN, (1,)
    y = pl.pallas_call(
        _forecast_kernel,
        out_shape=jax.ShapeDtypeStruct((BN, PRED_LEN), jnp.float32),
        grid=grid,
        in_specs=[pl.BlockSpec((rb, T), lambda r: (r, 0)),
                  pl.BlockSpec((HEAD_NF, PRED_LEN), lambda r: (0, 0)),
                  pl.BlockSpec((1, PRED_LEN), lambda r: (0, 0))],
        out_specs=pl.BlockSpec((rb, PRED_LEN), lambda r: (r, 0)),
        compiler_params=pltpu.CompilerParams(
            dimension_semantics=("parallel",)),   # shards rows across TCs when scaled up
    )(xr, fused["w_fused"], fused["b_fused"])
    # (B*N, pred_len) -> (B, pred_len, N)
    return y.reshape(Bb, Nv, PRED_LEN).transpose(0, 2, 1)


def model_forward(fused_params, x_enc, x_mark_enc=None, x_dec=None, x_mark_dec=None,
                  mask=None):
    dec_out = forecast(fused_params, x_enc)
    return {"task_output": dec_out[:, -PRED_LEN:, :]}


if __name__ == "__main__":
    key = jax.random.PRNGKey(0)
    kp, kx = jax.random.split(key)
    params = init_params(kp)
    fused = fold_params(params)          # offline weight fold (runs once)

    x_enc = jax.random.normal(kx, (B, SEQ_LEN, N_VARS), jnp.float32)
    x_mark_enc = jnp.zeros((B, SEQ_LEN, 4), jnp.float32)
    x_dec = jnp.zeros((B, PRED_LEN, N_VARS), jnp.float32)
    x_mark_dec = jnp.zeros((B, PRED_LEN, 4), jnp.float32)

    out = model_forward(fused, x_enc, x_mark_enc, x_dec, x_mark_dec)
    jax.block_until_ready(out["task_output"])
    assert out["task_output"].shape == (B, PRED_LEN, N_VARS)
    assert bool(jnp.all(jnp.isfinite(out["task_output"])))
    print("KERNEL_OK")
</pallas_src>

<mosaic_0001>
module attributes {stable_mosaic.version = 11 : i64} {
  func.func @_forecast_kernel(%arg0: i32, %arg1: memref<8x32xf32, #tpu.memory_space<vmem>>, %arg2: memref<64x8xf32, #tpu.memory_space<vmem>>, %arg3: memref<1x8xf32, #tpu.memory_space<vmem>>, %arg4: memref<8x8xf32, #tpu.memory_space<vmem>>) attributes {dimension_semantics = [#tpu.dimension_semantics<parallel>], iteration_bounds = array<i64: 1>, scalar_prefetch = 0 : i64, scratch_operands = 0 : i64, tpu.core_type = #tpu.core_type<tc>, window_params = [{transform_indices = @transform_0, window_bounds = array<i64: 8, 32>}, {pipeline_mode = #tpu.pipeline_mode<synchronous>, transform_indices = @transform_1, window_bounds = array<i64: 64, 8>}, {pipeline_mode = #tpu.pipeline_mode<synchronous>, transform_indices = @transform_2, window_bounds = array<i64: 1, 8>}, {transform_indices = @transform_3, window_bounds = array<i64: 8, 8>}]} {
    %c0 = arith.constant 0 : index
    %c0_0 = arith.constant 0 : index
    %0 = vector.load %arg1[%c0, %c0_0] : memref<8x32xf32, #tpu.memory_space<vmem>>, vector<8x32xf32>
    %cst = arith.constant dense<0.000000e+00> : vector<8xf32>
    %1 = vector.multi_reduction <add>, %0, %cst [1] : vector<8x32xf32> to vector<8xf32>
    %2 = vector.shape_cast %1 : vector<8xf32> to vector<8x1xf32>
    %cst_1 = arith.constant 3.200000e+01 : f32
    %3 = vector.broadcast %cst_1 : f32 to vector<8x1xf32>
    %4 = arith.divf %2, %3 : vector<8x1xf32>
    %5 = vector.broadcast %4 : vector<8x1xf32> to vector<8x32xf32>
    %6 = arith.subf %0, %5 : vector<8x32xf32>
    %7 = arith.mulf %6, %6 : vector<8x32xf32>
    %cst_2 = arith.constant dense<0.000000e+00> : vector<8xf32>
    %8 = vector.multi_reduction <add>, %7, %cst_2 [1] : vector<8x32xf32> to vector<8xf32>
    %9 = vector.shape_cast %8 : vector<8xf32> to vector<8x1xf32>
    %cst_3 = arith.constant 3.200000e+01 : f32
    %10 = vector.broadcast %cst_3 : f32 to vector<8x1xf32>
    %11 = arith.divf %9, %10 : vector<8x1xf32>
    %cst_4 = arith.constant 9.99999974E-6 : f32
    %12 = vector.broadcast %cst_4 : f32 to vector<8x1xf32>
    %13 = arith.addf %11, %12 : vector<8x1xf32>
    %14 = math.sqrt %13 : vector<8x1xf32>
    %15 = vector.broadcast %14 : vector<8x1xf32> to vector<8x32xf32>
    %16 = arith.divf %6, %15 : vector<8x32xf32>
    %17 = vector.extract_strided_slice %16 {offsets = [0, 31], sizes = [8, 1], strides = [1, 1]} : vector<8x32xf32> to vector<8x1xf32>
    %18 = vector.shape_cast %17 : vector<8x1xf32> to vector<8x1xf32>
    %19 = vector.broadcast %18 : vector<8x1xf32> to vector<8x8xf32>
    %20 = tpu.concatenate %16, %19 in 1 : vector<8x32xf32>, vector<8x8xf32> -> vector<8x40xf32>
    %21 = vector.extract_strided_slice %20 {offsets = [0, 0], sizes = [8, 16], strides = [1, 1]} : vector<8x40xf32> to vector<8x16xf32>
    %22 = vector.extract_strided_slice %20 {offsets = [0, 8], sizes = [8, 16], strides = [1, 1]} : vector<8x40xf32> to vector<8x16xf32>
    %23 = vector.extract_strided_slice %20 {offsets = [0, 16], sizes = [8, 16], strides = [1, 1]} : vector<8x40xf32> to vector<8x16xf32>
    %24 = vector.extract_strided_slice %20 {offsets = [0, 24], sizes = [8, 16], strides = [1, 1]} : vector<8x40xf32> to vector<8x16xf32>
    %25 = tpu.concatenate %21, %22, %23, %24 in 1 : vector<8x16xf32>, vector<8x16xf32>, vector<8x16xf32>, vector<8x16xf32> -> vector<8x64xf32>
    %c0_5 = arith.constant 0 : index
    %c0_6 = arith.constant 0 : index
    %26 = vector.load %arg2[%c0_5, %c0_6] : memref<64x8xf32, #tpu.memory_space<vmem>>, vector<64x8xf32>
    %cst_7 = arith.constant dense<0.000000e+00> : vector<8x8xf32>
    %27 = tpu.matmul %25, %26, %cst_7 {dimension_numbers = #tpu.dot_dimension_numbers<[1], [0], [0], [1], [0, 0, 1, 1], [], []>} : vector<8x64xf32>, vector<64x8xf32>, vector<8x8xf32> -> vector<8x8xf32>
    %c0_8 = arith.constant 0 : index
    %c0_9 = arith.constant 0 : index
    %28 = vector.load %arg3[%c0_8, %c0_9] : memref<1x8xf32, #tpu.memory_space<vmem>>, vector<1x8xf32>
    %29 = vector.broadcast %28 : vector<1x8xf32> to vector<8x8xf32>
    %30 = arith.addf %27, %29 : vector<8x8xf32>
    %31 = vector.broadcast %14 : vector<8x1xf32> to vector<8x8xf32>
    %32 = arith.mulf %30, %31 : vector<8x8xf32>
    %33 = vector.broadcast %4 : vector<8x1xf32> to vector<8x8xf32>
    %34 = arith.addf %32, %33 : vector<8x8xf32>
    %c0_10 = arith.constant 0 : index
    %c0_11 = arith.constant 0 : index
    %35 = vector.load %arg4[%c0_10, %c0_11] : memref<8x8xf32, #tpu.memory_space<vmem>>, vector<8x8xf32>
    tpu.vector_store %arg4[%c0_10, %c0_11], %34 {strides = array<i32>} : memref<8x8xf32, #tpu.memory_space<vmem>>, vector<8x8xf32>,
    return
  }
  func.func @transform_0(%arg0: i32) -> (i32, i32) {
    %c0_i32 = arith.constant 0 : i32
    %c0_i32_0 = arith.constant 0 : i32
    return %arg0, %c0_i32 : i32, i32
  }
  func.func @transform_1(%arg0: i32) -> (i32, i32) {
    %c0_i32 = arith.constant 0 : i32
    %c0_i32_0 = arith.constant 0 : i32
    %c0_i32_1 = arith.constant 0 : i32
    return %c0_i32, %c0_i32_0 : i32, i32
  }
  func.func @transform_2(%arg0: i32) -> (i32, i32) {
    %c0_i32 = arith.constant 0 : i32
    %c0_i32_0 = arith.constant 0 : i32
    %c0_i32_1 = arith.constant 0 : i32
    return %c0_i32, %c0_i32_0 : i32, i32
  }
  func.func @transform_3(%arg0: i32) -> (i32, i32) {
    %c0_i32 = arith.constant 0 : i32
    %c0_i32_0 = arith.constant 0 : i32
    return %arg0, %c0_i32 : i32, i32
  }
}

</mosaic_0001>

<bundles_post_ra>
// kernel: tpu_custom_call.1
= control target key start
LH: loop header
LB: loop body
LE: loop exit
PB: predicated region body
PF: predicated region fallthrough
CT: control target
= control target key end

     0   :  { %vm16_vm0 = vcmask 261120   ;;  %s248_s0 = inlined_call_operand.vmem [shape: f32[8,32], index: 0, kind: input, shape index: {}]   ;;  %s249_s1 = inlined_call_operand.vmem [shape: f32[64,8], index: 1, kind: input, shape index: {}]   ;;  %s250_s2 = inlined_call_operand.vmem [shape: f32[1,8], index: 2, kind: input, shape index: {}]   ;;  %s251_s3 = inlined_call_operand.hbm [shape: f32[8,8], index: 3, kind: output, shape index: {}]  }
   0x1   :  { %v15_v0 = vld [vmem:[%s248_s0] sm:$0xff] }
   0x2   :  { %v17_v1 = vsel %vm16_vm0, %v15_v0, 0.0 }
   0x3   :  { %8 = vsyncpa [#allocation3], 0  ;;  %18 = vadd.xlane.f32.xlu0 %v17_v1  ;;  %v181_v2 = vmov 32.0   ;;  %v182_v14 = vmov 31   ;;  %s183_s0 = smov 16   ;;  %s184_s14 = smov 8  }
   0x4   :  { %149 = vrcp.f32 %v181_v2  ;;  %146 = vset.pattern.permute.xlu1 %v182_v14  ;;  %147 = vset.pattern.permute.xlu0 %v182_v14  ;;  %s185_s15 = smov 24   ;;  %v90_v41 = vld [vmem:[%s249_s1 + $0x38] sm:$0xff]  ;;  %v89_v42 = vld [vmem:[%s249_s1 + $0x30] sm:$0xff]  ;;  %v88_v43 = vld [vmem:[%s249_s1 + $0x28] sm:$0xff]  ;;  %vm78_vm8 = vcmask 130048   ;;  %vm81_vm9 = vcmask 392192  }
   0x5   :  { %107 = vmatpush.msra.mxu0 %v90_v41  ;;  %v87_v44 = vld [vmem:[%s249_s1 + $0x20] sm:$0xff]  ;;  %v86_v45 = vld [vmem:[%s249_s1 + $0x18] sm:$0xff]  ;;  %v85_v46 = vld [vmem:[%s249_s1 + $0x10] sm:$0xff]  ;;  %vm95_vm10 = vcmask 523264   ;;  %s186_s7 = smov [#allocation2]   ;;  %s130_s10 = sshll.u32 %s251_s3, 4  ;;  %s131_s10 = int_to_ptr.hbm [resolvable:$true] %s130_s10 }
   0x6   :  { %v84_v47 = vld [vmem:[%s249_s1 + $0x8] sm:$0xff]  ;;  %v83_v48 = vld [vmem:[%s249_s1] sm:$0xff]  ;;  %s128_s1 = sshll.u32 %s186_s7, 4  ;;  %vm121_vm11 = vcmask 64512   ;;  %s129_s1 = int_to_ptr.vmem [resolvable:$true] %s128_s1 }
   0x7   :  { %108 = vmatpush.msra.mxu0 %v89_v42  ;;  %v148_v55 = vld [vmem:[%s250_s2] ss:$0 sm:$0xff] }
   0x9   :  { %109 = vmatpush.msra.mxu0 %v88_v43 }
   0xa   :  { %v150_v3 = vpop.eup %149 }
   0xb   :  { %v21_v4 = vmul.f32 32.0, %v150_v3  ;;  %vm25_vm1 = vweird.f32 %v150_v3  ;;  %110 = vmatpush.msra.mxu0 %v87_v44 }
   0xd   :  { %v22_v5 = vsub.f32 1.0, %v21_v4  ;;  %111 = vmatpush.msra.mxu0 %v86_v45 }
   0xf   :  { %v23_v6 = vmul.f32 %v150_v3, %v22_v5  ;;  %112 = vmatpush.msra.mxu0 %v85_v46 }
  0x11   :  { %v24_v7 = vadd.f32 %v150_v3, %v23_v6  ;;  %113 = vmatpush.msra.mxu0 %v84_v47 }
  0x13   :  { %v26_v8 = vsel %vm25_vm1, %v150_v3, %v24_v7  ;;  %114 = vmatpush.msra.mxu0 %v83_v48 }
  0x76   :  { %v19_v9 = vpop.xlane.xlu0 %18 }
  0x77   :  { %v211_v10 = vmul.f32 %v26_v8, %v19_v9 }
  0x79   :  { %v28_v11 = vsub.f32 %v15_v0, %v211_v10 }
  0x7b   :  { %v29_v12 = vmul.f32 %v28_v11, %v28_v11 }
  0x7d   :  { %v30_v13 = vsel %vm16_vm0, %v29_v12, 0.0 }
  0x7e   :  { %31 = vadd.xlane.f32.xlu0 %v30_v13 }
  0xf1   :  { %v32_v15 = vpop.xlane.xlu0 %31 }
  0xf2   :  { %v33_v16 = vmul.f32 %v32_v15, %v26_v8 }
  0xf4   :  { %v34_v17 = vadd.f32 1e-05, %v33_v16 }
  0xf6   :  { %151 = vrsqrt.f32 %v34_v17  ;;  %vm42_vm2 = vcmp.eq.f32.partialorder %v34_v17, inf  ;;  %v45_v25 = vand.u32 2147483648, %v34_v17  ;;  %vm44_vm3 = vcmp.eq.f32.partialorder %v34_v17, 0.0 }
  0xfc   :  { %v152_v18 = vpop.eup %151 }
  0xfd   :  { %v36_v19 = vmul.f32 %v152_v18, %v34_v17 }
  0xff   :  { %v37_v20 = vmul.f32 %v152_v18, %v36_v19 }
 0x101   :  { %v38_v21 = vmul.f32 0.5, %v37_v20 }
 0x103   :  { %v39_v22 = vsub.f32 1.5, %v38_v21 }
 0x105   :  { %v40_v23 = vmul.f32 %v152_v18, %v39_v22 }
 0x107   :  { %v41_v24 = vmul.f32 %v40_v23, %v34_v17 }
 0x109   :  { %v43_v26 = vsel %vm42_vm2, %v34_v17, %v41_v24 }
 0x10a   :  { %v46_v27 = vsel %vm44_vm3, %v45_v25, %v43_v26 }
 0x10b   :  { %153 = vrcp.f32 %v46_v27  ;;  %v58_v31 = vand.u32 2147483648, %v46_v27  ;;  %v56_v33 = vand.u32 2147483647, %v46_v27  ;;  %vm52_vm5 = vweird.f32 %v46_v27 }
 0x10d   :  { %v59_v35 = vor.u32 1.1754944e-38, %v58_v31  ;;  %vm57_vm7 = vcmp.eq.f32.partialorder %v56_v33, 8.507059e+37 }
 0x111   :  { %v154_v28 = vpop.eup %153 }
 0x112   :  { %v48_v29 = vmul.f32 %v154_v28, %v46_v27  ;;  %vm53_vm4 = vweird.f32 %v154_v28 }
 0x113   :  { %vm54_vm6 = vmor %vm52_vm5, %vm53_vm4 }
 0x114   :  { %v49_v30 = vsub.f32 1.0, %v48_v29 }
 0x116   :  { %v50_v32 = vmul.f32 %v154_v28, %v49_v30 }
 0x118   :  { %v51_v34 = vadd.f32 %v154_v28, %v50_v32 }
 0x11a   :  { %v55_v36 = vsel %vm54_vm6, %v154_v28, %v51_v34 }
 0x11b   :  { %v60_v37 = vsel %vm57_vm7, %v59_v35, %v55_v36 }
 0x11c   :  { %v61_v38 = vmul.f32 %v60_v37, %v28_v11 }
 0x11e   :  { %64 = vperm.xlu1 %146, %v61_v38  }
 0x190   :  { %v65_v39 = vpop.permute.xlu1 %64 }
 0x191   :  { %v67_v40 = vsel %vm16_vm0, %v61_v38, %v65_v39 }
 0x192   :  { %72 = vrot.lane.b32.xlu2 %v67_v40, %s183_s0  ;;  %69 = vrot.lane.b32.xlu1 %v67_v40, %s184_s14 }
 0x19a   :  { %75 = vrot.lane.b32.xlu2 %v67_v40, %s185_s15 }
 0x1ec   :  { %v73_v49 = vpop.permute.xlu2 %72 }
 0x1f4   :  { %v76_v52 = vpop.permute.xlu2 %75 }
 0x204   :  { %v70_v50 = vpop.permute.xlu1 %69 }
 0x205   :  { %v79_v51 = vsel %vm78_vm8, %v67_v40, %v70_v50 }
 0x206   :  { %v80_v53 = vsel %vm16_vm0, %v79_v51, %v73_v49 }
 0x207   :  { %v82_v54 = vsel %vm81_vm9, %v80_v53, %v76_v52 }
 0x208   :  { %139 = vmatmul.msk.f32.vlgmr.msra.gmra.mxu0 %vm95_vm10, %v82_v54 }
 0x285   :  { %v116_v56 = vpop.f32.mrf.mxu0 }
 0x286   :  { %v117_v57 = vadd.f32 %v148_v55, %v116_v56 }
 0x288   :  { %v119_v58 = vmul.f32 %v117_v57, %v46_v27 }
 0x28a   :  { %v120_v59 = vadd.f32 %v119_v58, %v211_v10 }
 0x28c   :  { %122 = vst.msk [vmem:[#allocation2] sm:$0xff] %vm121_vm11, %v120_v59 }
 0x28d   :  { %133 = dma.vmem_to_hbm [thread:$0]  %s129_s1, 128, %s131_s10, [#allocation3]  }
 0x28e   :  { %179 = dma.done.wait [#allocation3], 128  }
 0x28f   :  { %180 = vsyncadd [#allocation3], 4294967168 }
 0x290   :  { %138 = vsyncpa [#allocation3], 1 }

</bundles_post_ra>
